<compile_context>
chip_gen: v6e
topology: v6e:2x2x1
jax: 0.10.0
libtpu: 0.0.40
codegen_flags: <defaults>
</compile_context>

<pallas_src>
import functools

import jax
import jax.numpy as jnp
from jax.experimental import pallas as pl
from jax.experimental.pallas import tpu as pltpu

# Action type codes (flattened from the PyTorch ActionType enum / match statement).
WAIT, PICK, TRANSPORT, MOVE = 0, 1, 2, 3
_LEAKY_SLOPE = 0.01  # PyTorch nn.LeakyReLU default negative_slope


def _action_encoder_kernel(type_ref, x_ref, w1_ref, b1_ref, w2_ref, b2_ref,
                           wait_ref, out_ref):
    # Fused layer 1: a single K=64 MXU pass over the concatenated
    # [AGV | op_from | op_to | machine] slab against the fused (64, 3*hid) weight.
    h = jnp.dot(x_ref[...], w1_ref[...],
                preferred_element_type=jnp.float32) + b1_ref[...]
    h = jnp.where(h > 0, h, _LEAKY_SLOPE * h)            # LeakyReLU

    # Fused layer 2: block-diagonal weight -> (block, 3 * c_out), f32 accumulate.
    y = jnp.dot(h.astype(w2_ref.dtype), w2_ref[...],
                preferred_element_type=jnp.float32) + b2_ref[...]

    c = out_ref.shape[-1]
    t = type_ref[...]                                    # (block, 1) int32
    out = jnp.where(
        t == PICK, y[:, 0:c],
        jnp.where(t == TRANSPORT, y[:, c:2 * c],
                  jnp.where(t == MOVE, y[:, 2 * c:3 * c], wait_ref[...])))
    out_ref[...] = out.astype(out_ref.dtype)


def _round_up(x, m):
    return (x + m - 1) // m * m


def fuse_params(params, node_channels):
    """Fuse the pick/transport/move MLPs into one (w1, b1, w2, b2) set.

    Called ONCE per weight update (outside the per-call jit) so the concats /
    block_diag are not rebuilt and round-tripped through HBM on every forward.
    Matmul weights are stored bf16 (MXU-native operands); biases stay f32.
    """
    c_op, c_mac, c_agv = node_channels
    w1p, b1p, w2p, b2p = params["pick"]        # input order [AGV, opF, opT, machine]
    w1t, b1t, w2t, b2t = params["transport"]   # input order [AGV, machine]
    w1m, b1m, w2m, b2m = params["move"]        # input order [AGV, machine]
    hid = w1p.shape[1]

    def expand_tm(w):   # (c_agv + c_mac, hid) -> (c_agv + 2*c_op + c_mac, hid)
        z = jnp.zeros((c_op, hid), w.dtype)
        return jnp.concatenate([w[:c_agv], z, z, w[c_agv:]], axis=0)

    w1 = jnp.concatenate([w1p, expand_tm(w1t), expand_tm(w1m)], axis=1)
    b1 = jnp.concatenate([b1p, b1t, b1m]).reshape(1, 3 * hid)
    w2 = jax.scipy.linalg.block_diag(w2p, w2t, w2m)      # (3*hid, 3*c_out)
    b2 = jnp.concatenate([b2p, b2t, b2m]).reshape(1, -1)
    c_out = params["wait_emb"].shape[-1]
    return {
        "w1": w1.astype(jnp.bfloat16),
        "b1": b1.astype(jnp.float32),
        "w2": w2.astype(jnp.bfloat16),
        "b2": b2.astype(jnp.float32),
        "wait": params["wait_emb"].reshape(1, c_out).astype(jnp.float32),
    }


@functools.partial(jax.jit, static_argnames=("block_rows",))
def action_encoder_forward(fused, embeddings, action_type,
                           agv_idx, op_from_idx, op_to_idx, machine_idx,
                           block_rows: int = 2048):
    """Encode a flat list of N actions; returns (N, out_channels) f32 encodings.

    Index arrays must already be resolved to global rows of the embedding tables
    (offsets + IdIdxMapper applied on host).  The caller splits the result back
    into per-batch lists if needed.
    """
    n = action_type.shape[0]
    c_out = fused["wait"].shape[-1]

    # Embedding gathers + concat into ONE lane-dense slab (data-dependent; XLA
    # fuses the takes into the concat output, so this is essentially free).
    x = jnp.concatenate([
        jnp.take(embeddings["AGV"], agv_idx, axis=0),
        jnp.take(embeddings["operation"], op_from_idx, axis=0),
        jnp.take(embeddings["operation"], op_to_idx, axis=0),
        jnp.take(embeddings["machine"], machine_idx, axis=0),
    ], axis=1).astype(fused["w1"].dtype)
    t = action_type.reshape(n, 1).astype(jnp.int32)

    # Big blocks amortize the ~0.35us per-grid-step overhead; cap the block so
    # the grid has >= 2 steps whenever possible (v7x has 2 TensorCores and the
    # "parallel" action axis gets sharded across them).
    block = max(8, min(block_rows, _round_up(pl.cdiv(n, 2), 8)))
    n_pad = _round_up(n, block)
    pad = n_pad - n
    if pad:
        t = jnp.pad(t, ((0, pad), (0, 0)))     # padded rows are WAIT, sliced off below
        x = jnp.pad(x, ((0, pad), (0, 0)))

    k_in = x.shape[1]
    grid = (n_pad // block,)

    def row_spec(feat):
        return pl.BlockSpec((block, feat), lambda i: (i, 0))

    def const_spec(a):   # whole array resident in VMEM, same block every step
        return pl.BlockSpec(a.shape, lambda i: (0, 0))

    weights = (fused["w1"], fused["b1"], fused["w2"], fused["b2"], fused["wait"])
    hid3 = fused["w1"].shape[1]
    c3 = fused["w2"].shape[1]
    flops = 2 * n_pad * (k_in * hid3 + hid3 * c3)
    bytes_accessed = (
        n_pad * (4 + 2 * k_in + 4 * c_out)
        + sum(int(a.size) * a.dtype.itemsize for a in weights))

    out = pl.pallas_call(
        _action_encoder_kernel,
        grid_spec=pltpu.PrefetchScalarGridSpec(
            num_scalar_prefetch=0,
            grid=grid,
            in_specs=[row_spec(1), row_spec(k_in)]
                     + [const_spec(a) for a in weights],
            out_specs=row_spec(c_out),
        ),
        out_shape=jax.ShapeDtypeStruct((n_pad, c_out), jnp.float32),
        compiler_params=pltpu.CompilerParams(
            dimension_semantics=("parallel",)),
        cost_estimate=pl.CostEstimate(
            flops=flops, transcendentals=0, bytes_accessed=bytes_accessed),
    )(t, x, *weights)

    return out[:n]


def init_params(key, out_channels: int, node_channels):
    """PyTorch-Linear-equivalent params, stored transposed as (in, out)."""
    c_op, c_mac, c_agv = node_channels

    def linear(k, fan_in, fan_out):
        kw, kb = jax.random.split(k)
        bound = 1.0 / jnp.sqrt(jnp.float32(fan_in))
        w = jax.random.uniform(kw, (fan_in, fan_out), jnp.float32, -bound, bound)
        b = jax.random.uniform(kb, (fan_out,), jnp.float32, -bound, bound)
        return w, b

    hid = 2 * out_channels
    keys = jax.random.split(key, 7)
    pick_in = c_agv + 2 * c_op + c_mac     # cat([AGV, op_from, op_to, machine])
    tm_in = c_agv + c_mac                  # cat([AGV, machine])
    w1p, b1p = linear(keys[0], pick_in, hid)
    w2p, b2p = linear(keys[1], hid, out_channels)
    w1t, b1t = linear(keys[2], tm_in, hid)
    w2t, b2t = linear(keys[3], hid, out_channels)
    w1m, b1m = linear(keys[4], tm_in, hid)
    w2m, b2m = linear(keys[5], hid, out_channels)
    # PyTorch inits wait_emb to zeros; use small random values so the wait select
    # path is actually exercised by the self-test (it's a learned parameter).
    wait_emb = 0.1 * jax.random.normal(keys[6], (out_channels,), jnp.float32)
    return {
        "wait_emb": wait_emb,
        "pick": (w1p, b1p, w2p, b2p),
        "transport": (w1t, b1t, w2t, b2t),
        "move": (w1m, b1m, w2m, b2m),
    }


def _reference_forward(params, embeddings, actions):
    """Per-action reference mirroring the PyTorch match/cat control flow.

    Matmul operands are cast to bf16 (f32 accumulation) to mirror the kernel's
    MXU numerics, so the self-check tolerance can stay tight.
    """
    def mlp(x, w1, b1, w2, b2):
        h = jnp.dot(x.astype(jnp.bfloat16), w1.astype(jnp.bfloat16),
                    preferred_element_type=jnp.float32) + b1
        h = jnp.where(h > 0, h, _LEAKY_SLOPE * h)
        return jnp.dot(h.astype(jnp.bfloat16), w2.astype(jnp.bfloat16),
                       preferred_element_type=jnp.float32) + b2

    outs = []
    for (t, agv, opf, opt, mac) in actions:
        if t == WAIT:
            outs.append(params["wait_emb"])
        elif t == PICK:
            x = jnp.concatenate([
                embeddings["AGV"][agv], embeddings["operation"][opf],
                embeddings["operation"][opt], embeddings["machine"][mac]])
            outs.append(mlp(x, *params["pick"]))
        elif t == TRANSPORT:
            x = jnp.concatenate([embeddings["AGV"][agv], embeddings["machine"][mac]])
            outs.append(mlp(x, *params["transport"]))
        else:  # MOVE
            x = jnp.concatenate([embeddings["AGV"][agv], embeddings["machine"][mac]])
            outs.append(mlp(x, *params["move"]))
    return jnp.stack(outs)


if __name__ == "__main__":
    out_channels = 32
    node_channels = (16, 16, 16)      # (operation, machine, AGV) channels
    n_op, n_mac, n_agv = 12, 6, 4
    n_actions = 22

    key = jax.random.PRNGKey(0)
    k_params, k_op, k_mac, k_agv, k_act = jax.random.split(key, 5)

    params = init_params(k_params, out_channels, node_channels)
    fused = fuse_params(params, node_channels)
    embeddings = {
        "operation": jax.random.normal(k_op, (n_op, node_channels[0]), jnp.float32),
        "machine": jax.random.normal(k_mac, (n_mac, node_channels[1]), jnp.float32),
        "AGV": jax.random.normal(k_agv, (n_agv, node_channels[2]), jnp.float32),
    }

    # Flat action arrays (type + pre-resolved global embedding-row indices).
    k_t, k_a, k_f, k_o, k_m = jax.random.split(k_act, 5)
    types = jax.random.randint(k_t, (n_actions,), 0, 4, jnp.int32)
    agv_i = jax.random.randint(k_a, (n_actions,), 0, n_agv, jnp.int32)
    opf_i = jax.random.randint(k_f, (n_actions,), 0, n_op, jnp.int32)
    opt_i = jax.random.randint(k_o, (n_actions,), 0, n_op, jnp.int32)
    mac_i = jax.random.randint(k_m, (n_actions,), 0, n_mac, jnp.int32)

    out = action_encoder_forward(fused, embeddings, types,
                                 agv_i, opf_i, opt_i, mac_i)
    jax.block_until_ready(out)

    actions_host = list(zip([int(x) for x in types], [int(x) for x in agv_i],
                            [int(x) for x in opf_i], [int(x) for x in opt_i],
                            [int(x) for x in mac_i]))
    ref = _reference_forward(params, embeddings, actions_host)

    assert out.shape == (n_actions, out_channels)
    assert jnp.allclose(out, ref, atol=2e-3, rtol=2e-3)
    print("KERNEL_OK")
</pallas_src>

<mosaic_0001>
module attributes {stable_mosaic.version = 11 : i64} {
  func.func @_action_encoder_kernel(%arg0: i32, %arg1: memref<16x1xi32, #tpu.memory_space<vmem>>, %arg2: memref<16x64xbf16, #tpu.memory_space<vmem>>, %arg3: memref<64x192xbf16, #tpu.memory_space<vmem>>, %arg4: memref<1x192xf32, #tpu.memory_space<vmem>>, %arg5: memref<192x96xbf16, #tpu.memory_space<vmem>>, %arg6: memref<1x96xf32, #tpu.memory_space<vmem>>, %arg7: memref<1x32xf32, #tpu.memory_space<vmem>>, %arg8: memref<16x32xf32, #tpu.memory_space<vmem>>) attributes {dimension_semantics = [#tpu.dimension_semantics<parallel>], iteration_bounds = array<i64: 2>, scalar_prefetch = 0 : i64, scratch_operands = 0 : i64, tpu.core_type = #tpu.core_type<tc>, window_params = [{transform_indices = @transform_0, window_bounds = array<i64: 16, 1>}, {transform_indices = @transform_1, window_bounds = array<i64: 16, 64>}, {pipeline_mode = #tpu.pipeline_mode<synchronous>, transform_indices = @transform_2, window_bounds = array<i64: 64, 192>}, {pipeline_mode = #tpu.pipeline_mode<synchronous>, transform_indices = @transform_3, window_bounds = array<i64: 1, 192>}, {pipeline_mode = #tpu.pipeline_mode<synchronous>, transform_indices = @transform_4, window_bounds = array<i64: 192, 96>}, {pipeline_mode = #tpu.pipeline_mode<synchronous>, transform_indices = @transform_5, window_bounds = array<i64: 1, 96>}, {pipeline_mode = #tpu.pipeline_mode<synchronous>, transform_indices = @transform_6, window_bounds = array<i64: 1, 32>}, {transform_indices = @transform_7, window_bounds = array<i64: 16, 32>}]} {
    %c0 = arith.constant 0 : index
    %c0_0 = arith.constant 0 : index
    %0 = vector.load %arg2[%c0, %c0_0] : memref<16x64xbf16, #tpu.memory_space<vmem>>, vector<16x64xbf16>
    %c0_1 = arith.constant 0 : index
    %c0_2 = arith.constant 0 : index
    %1 = vector.load %arg3[%c0_1, %c0_2] : memref<64x192xbf16, #tpu.memory_space<vmem>>, vector<64x192xbf16>
    %cst = arith.constant dense<0.000000e+00> : vector<16x192xf32>
    %2 = tpu.matmul %0, %1, %cst {dimension_numbers = #tpu.dot_dimension_numbers<[1], [0], [0], [1], [0, 0, 1, 1], [], []>} : vector<16x64xbf16>, vector<64x192xbf16>, vector<16x192xf32> -> vector<16x192xf32>
    %c0_3 = arith.constant 0 : index
    %c0_4 = arith.constant 0 : index
    %3 = vector.load %arg4[%c0_3, %c0_4] : memref<1x192xf32, #tpu.memory_space<vmem>>, vector<1x192xf32>
    %4 = vector.broadcast %3 : vector<1x192xf32> to vector<16x192xf32>
    %5 = arith.addf %2, %4 : vector<16x192xf32>
    %cst_5 = arith.constant 0.000000e+00 : f32
    %6 = vector.broadcast %cst_5 : f32 to vector<16x192xf32>
    %7 = arith.cmpf ogt, %5, %6 : vector<16x192xf32>
    %cst_6 = arith.constant 0.00999999977 : f32
    %8 = vector.broadcast %cst_6 : f32 to vector<16x192xf32>
    %9 = arith.mulf %8, %5 : vector<16x192xf32>
    %10 = arith.select %7, %5, %9 : vector<16x192xi1>, vector<16x192xf32>
    %11 = arith.truncf %10 : vector<16x192xf32> to vector<16x192xbf16>
    %c0_7 = arith.constant 0 : index
    %c0_8 = arith.constant 0 : index
    %12 = vector.load %arg5[%c0_7, %c0_8] : memref<192x96xbf16, #tpu.memory_space<vmem>>, vector<192x96xbf16>
    %cst_9 = arith.constant dense<0.000000e+00> : vector<16x96xf32>
    %13 = tpu.matmul %11, %12, %cst_9 {dimension_numbers = #tpu.dot_dimension_numbers<[1], [0], [0], [1], [0, 0, 1, 1], [], []>} : vector<16x192xbf16>, vector<192x96xbf16>, vector<16x96xf32> -> vector<16x96xf32>
    %c0_10 = arith.constant 0 : index
    %c0_11 = arith.constant 0 : index
    %14 = vector.load %arg6[%c0_10, %c0_11] : memref<1x96xf32, #tpu.memory_space<vmem>>, vector<1x96xf32>
    %15 = vector.broadcast %14 : vector<1x96xf32> to vector<16x96xf32>
    %16 = arith.addf %13, %15 : vector<16x96xf32>
    %c0_12 = arith.constant 0 : index
    %c0_13 = arith.constant 0 : index
    %17 = vector.load %arg1[%c0_12, %c0_13] : memref<16x1xi32, #tpu.memory_space<vmem>>, vector<16x1xi32>
    %c1_i32 = arith.constant 1 : i32
    %18 = vector.broadcast %c1_i32 : i32 to vector<16x1xi32>
    %19 = arith.cmpi eq, %17, %18 : vector<16x1xi32>
    %20 = vector.extract_strided_slice %16 {offsets = [0, 0], sizes = [16, 32], strides = [1, 1]} : vector<16x96xf32> to vector<16x32xf32>
    %c2_i32 = arith.constant 2 : i32
    %21 = vector.broadcast %c2_i32 : i32 to vector<16x1xi32>
    %22 = arith.cmpi eq, %17, %21 : vector<16x1xi32>
    %23 = vector.extract_strided_slice %16 {offsets = [0, 32], sizes = [16, 32], strides = [1, 1]} : vector<16x96xf32> to vector<16x32xf32>
    %c3_i32 = arith.constant 3 : i32
    %24 = vector.broadcast %c3_i32 : i32 to vector<16x1xi32>
    %25 = arith.cmpi eq, %17, %24 : vector<16x1xi32>
    %26 = vector.extract_strided_slice %16 {offsets = [0, 64], sizes = [16, 32], strides = [1, 1]} : vector<16x96xf32> to vector<16x32xf32>
    %c0_14 = arith.constant 0 : index
    %c0_15 = arith.constant 0 : index
    %27 = vector.load %arg7[%c0_14, %c0_15] : memref<1x32xf32, #tpu.memory_space<vmem>>, vector<1x32xf32>
    %28 = vector.shape_cast %25 : vector<16x1xi1> to vector<16x1xi1>
    %29 = vector.broadcast %28 : vector<16x1xi1> to vector<16x32xi1>
    %30 = vector.shape_cast %27 : vector<1x32xf32> to vector<1x32xf32>
    %31 = vector.broadcast %30 : vector<1x32xf32> to vector<16x32xf32>
    %32 = arith.select %29, %26, %31 : vector<16x32xi1>, vector<16x32xf32>
    %33 = vector.shape_cast %22 : vector<16x1xi1> to vector<16x1xi1>
    %34 = vector.broadcast %33 : vector<16x1xi1> to vector<16x32xi1>
    %35 = arith.select %34, %23, %32 : vector<16x32xi1>, vector<16x32xf32>
    %36 = vector.shape_cast %19 : vector<16x1xi1> to vector<16x1xi1>
    %37 = vector.broadcast %36 : vector<16x1xi1> to vector<16x32xi1>
    %38 = arith.select %37, %20, %35 : vector<16x32xi1>, vector<16x32xf32>
    %c0_16 = arith.constant 0 : index
    %c0_17 = arith.constant 0 : index
    %39 = vector.load %arg8[%c0_16, %c0_17] : memref<16x32xf32, #tpu.memory_space<vmem>>, vector<16x32xf32>
    tpu.vector_store %arg8[%c0_16, %c0_17], %38 {strides = array<i32>} : memref<16x32xf32, #tpu.memory_space<vmem>>, vector<16x32xf32>,
    return
  }
  func.func @transform_0(%arg0: i32) -> (i32, i32) {
    %c0_i32 = arith.constant 0 : i32
    %c0_i32_0 = arith.constant 0 : i32
    return %arg0, %c0_i32 : i32, i32
  }
  func.func @transform_1(%arg0: i32) -> (i32, i32) {
    %c0_i32 = arith.constant 0 : i32
    %c0_i32_0 = arith.constant 0 : i32
    return %arg0, %c0_i32 : i32, i32
  }
  func.func @transform_2(%arg0: i32) -> (i32, i32) {
    %c0_i32 = arith.constant 0 : i32
    %c0_i32_0 = arith.constant 0 : i32
    %c0_i32_1 = arith.constant 0 : i32
    return %c0_i32, %c0_i32_0 : i32, i32
  }
  func.func @transform_3(%arg0: i32) -> (i32, i32) {
    %c0_i32 = arith.constant 0 : i32
    %c0_i32_0 = arith.constant 0 : i32
    %c0_i32_1 = arith.constant 0 : i32
    return %c0_i32, %c0_i32_0 : i32, i32
  }
  func.func @transform_4(%arg0: i32) -> (i32, i32) {
    %c0_i32 = arith.constant 0 : i32
    %c0_i32_0 = arith.constant 0 : i32
    %c0_i32_1 = arith.constant 0 : i32
    return %c0_i32, %c0_i32_0 : i32, i32
  }
  func.func @transform_5(%arg0: i32) -> (i32, i32) {
    %c0_i32 = arith.constant 0 : i32
    %c0_i32_0 = arith.constant 0 : i32
    %c0_i32_1 = arith.constant 0 : i32
    return %c0_i32, %c0_i32_0 : i32, i32
  }
  func.func @transform_6(%arg0: i32) -> (i32, i32) {
    %c0_i32 = arith.constant 0 : i32
    %c0_i32_0 = arith.constant 0 : i32
    %c0_i32_1 = arith.constant 0 : i32
    return %c0_i32, %c0_i32_0 : i32, i32
  }
  func.func @transform_7(%arg0: i32) -> (i32, i32) {
    %c0_i32 = arith.constant 0 : i32
    %c0_i32_0 = arith.constant 0 : i32
    return %arg0, %c0_i32 : i32, i32
  }
}

</mosaic_0001>

<bundles_post_ra>
// kernel: action_encoder_forward.1
= control target key start
LH: loop header
LB: loop body
LE: loop exit
PB: predicated region body
PF: predicated region fallthrough
CT: control target
= control target key end

     0   :  { %s847_s24 = smov 0   ;;  %s972_s0 = inlined_call_operand.vmem [shape: s32[32,1], index: 0, kind: input, shape index: {}]   ;;  %s973_s1 = inlined_call_operand.vmem [shape: bf16[32,64], index: 1, kind: input, shape index: {}]   ;;  %s974_s2 = inlined_call_operand.vmem [shape: bf16[64,192], index: 2, kind: input, shape index: {}]   ;;  %s975_s3 = inlined_call_operand.vmem [shape: f32[1,192], index: 3, kind: input, shape index: {}]   ;;  %s976_s4 = inlined_call_operand.vmem [shape: bf16[192,96], index: 4, kind: input, shape index: {}]   ;;  %s977_s5 = inlined_call_operand.vmem [shape: f32[1,96], index: 5, kind: input, shape index: {}]   ;;  %s978_s6 = inlined_call_operand.vmem [shape: f32[1,32], index: 6, kind: input, shape index: {}]   ;;  %s979_s7 = inlined_call_operand.vmem [shape: f32[32,32], index: 7, kind: output, shape index: {}]  }
   0x1 LB: > { %s720_s25 = sadd.s32 4294967295, %s802_s24   ;;  %p724_p0 = scmp.ge.s32.totalorder %s802_s24, 1  ;;  %s802_s24 = sphi %s847_s24, %s17_s24  }
   0x2   : > { %p249_p1 = scmp.lt.s32.totalorder %s802_s24, 3 }
   0x4   : > { %p250_p2 = pnand %p724_p0, %p249_p1 }
   0x5   : > { %s725_s28 = sshll.u32 (!%p250_p2), %s720_s25, 1  ;;  %s805_s12 = smov (!%p250_p2), 64  }
   0x6   : > { %253 = sbr.rel (%p250_p2) target bundleno = 669 (0x29d), region = 48  ;;  %p287_p3 = scmp.lt.s32.totalorder (!%p250_p2), %s725_s28, 3 }
   0x7   : > { %s806_s17 = smov (!%p250_p2), 96  }
   0xb   : > { %v771_v0 = vld [vmem:[%s974_s2 + $0x34] ss:$8 sps:$4 sm:$0xff]   ;;  %v773_v1 = vld [vmem:[%s974_s2 + $0x30] ss:$8 sps:$4 sm:$0xff]   ;;  %v804_v2 = vmov 0   ;;  %s981_s28 = smov (!%p287_p3, %s725_s28), 3  ;;  %v317_v29 = vlaneseq }
   0xc   : > { %408 = vmatprep.mubr.bf16.mxu0 %v804_v2  ;;  %539 = vmatprep.subr.bf16.mxu1 %v804_v2  ;;  %v774_v3 = vld [vmem:[%s974_s2 + $0x24] ss:$8 sps:$4 sm:$0xff]   ;;  %v776_v4 = vld [vmem:[%s974_s2 + $0x20] ss:$8 sps:$4 sm:$0xff]   ;;  %v777_v5 = vld [vmem:[%s974_s2 + $0x14] ss:$8 sps:$4 sm:$0xff]  }
   0xd   : > { %384 = vmatprep.subr.bf16.mxu0 %v771_v0  ;;  %769 = vset.pattern.permute.xlu0 %v804_v2  ;;  %v779_v6 = vld [vmem:[%s974_s2 + $0x10] ss:$8 sps:$4 sm:$0xff]   ;;  %s728_s16 = sshll.u32 %s981_s28, 2  ;;  %v780_v8 = vld [vmem:[%s974_s2 + $0x4] ss:$8 sps:$4 sm:$0xff]   ;;  %vm372_vm0 = vcmask 523264  }
   0xe   : > { %385 = vmatpush1.bf16.msra.mxu0 %v773_v1  ;;  %770 = vset.pattern.permute.xlu1 %v804_v2  ;;  %v784_v7 = vld [vmem:[%s976_s4 + $0x38] sm:$0xff]   ;;  %s296_s21 = scalar_lea.vmem %s973_s1, %s728_s16  ;;  %v785_v9 = vld [vmem:[%s976_s4 + $0x30] sm:$0xff]   ;;  %v782_v10 = vld [vmem:[%s974_s2] ss:$8 sps:$4 sm:$0xff]   ;;  %s726_s29 = sshll.u32 %s981_s28, 3  ;;  %v318_v30 = vshrl.u32 %v317_v29, 7 }
   0xf   : > { %386 = vmatprep.subr.bf16.mxu0 %v774_v3  ;;  %540 = vmatpush1.bf16.msra.mxu1 %v784_v7  ;;  %v786_v11 = vld [vmem:[%s976_s4 + $0x28] sm:$0xff]   ;;  %v783_v12 = vld [vmem:[%s296_s21] sm:$0xff]   ;;  %v788_v14 = vld [vmem:[%s976_s4 + $0x18] sm:$0xff]   ;;  %s290_s11 = scalar_lea.vmem %s972_s0, %s726_s29  ;;  %s302_s20 = scalar_lea.vmem %s979_s7, %s726_s29  ;;  %vm649_vm15 = vcmask 261120  }
  0x10   : > { %541 = vmatprep.subr.bf16.mxu1 %v804_v2  ;;  %v787_v13 = vld [vmem:[%s976_s4 + $0x20] sm:$0xff]   ;;  %v789_v15 = vld [vmem:[%s976_s4 + $0x10] sm:$0xff]   ;;  %v790_v16 = vld [vmem:[%s976_s4 + $0x8] sm:$0xff]   ;;  %v323_v31 = vsub.s32 1, %v318_v30  ;;  %v319_v32 = vsub.s32 0, %v318_v30 }
  0x11   : > { %v791_v17 = vld [vmem:[%s976_s4] sm:$0xff]   ;;  %v792_v18 = vld [vmem:[%s976_s4 + $0x58] sm:$0xff]   ;;  %v793_v19 = vld [vmem:[%s976_s4 + $0x50] sm:$0xff]  }
  0x12   : > { %387 = vmatpush1.bf16.msra.mxu0 %v776_v4  ;;  %v794_v20 = vld [vmem:[%s976_s4 + $0x48] sm:$0xff]   ;;  %v795_v21 = vld [vmem:[%s976_s4 + $0x40] sm:$0xff]  }
  0x13   : > { %388 = vmatprep.subr.bf16.mxu0 %v777_v5  ;;  %542 = vmatpush1.bf16.msra.mxu1 %v785_v9  ;;  %v755_v22 = vld [vmem:[%s978_s6] ss:$0 sm:$0xff]  ;;  %v946_v24 = vld [vmem:[%s290_s11 + $0x8] sm:$0xff] }
  0x14   : > { %543 = vmatprep.subr.bf16.mxu1 %v804_v2  ;;  %604 = vrot.lane.b32.xlu1 %v755_v22, %s805_s12  ;;  %v580_v23 = vld [vmem:[%s290_s11] sm:$0xff]  ;;  %vm587_vm2 = vcmp.eq.s32.totalorder %v946_v24, 3  ;;  %vm585_vm4 = vcmp.eq.s32.totalorder %v946_v24, 2  ;;  %vm583_vm12 = vcmp.eq.s32.totalorder %v946_v24, 1 }
  0x15   : > { %vm586_vm1 = vcmp.eq.s32.totalorder %v580_v23, 3  ;;  %vm584_vm3 = vcmp.eq.s32.totalorder %v580_v23, 2  ;;  %v590_v27 = vsel %vm587_vm2, 1, %v804_v2  ;;  %v610_v28 = vsel %vm585_vm4, 1, %v804_v2  ;;  %v315_v33 = vld [vmem:[%s975_s3] sm:$0x3] }
  0x16   : > { %389 = vmatpush1.bf16.msra.mxu0 %v779_v6  ;;  %v589_v25 = vsel %vm586_vm1, 1, %v804_v2  ;;  %v609_v26 = vsel %vm584_vm3, 1, %v804_v2  ;;  %v324_v34 = vrot.slane %v315_v33, %v323_v31  ;;  %v320_v35 = vrot.slane %v315_v33, %v319_v32  ;;  %v741_v54 = vld [vmem:[%s977_s5] ss:$0 sm:$0xff] }
  0x17   : > { %390 = vmatprep.subr.bf16.mxu0 %v780_v8  ;;  %544 = vmatpush1.bf16.msra.mxu1 %v786_v11  ;;  %vm582_vm10 = vcmp.eq.s32.totalorder %v580_v23, 1  ;;  %v630_v4 = vsel %vm583_vm12, 1, %v804_v2 }
  0x18   : > { %545 = vmatprep.subr.bf16.mxu1 %v804_v2  ;;  %592 = vperm.xlu0 %769, %v589_v25   ;;  %v629_v0 = vsel %vm582_vm10, 1, %v804_v2 }
  0x19   : > { %612 = vperm.xlu1 %770, %v609_v26  }
  0x1a   : > { %391 = vmatpush1.bf16.msra.mxu0 %v782_v10 }
  0x1b   : > { %546 = vmatpush1.bf16.msra.mxu1 %v787_v13 }
  0x1c   : > { %547 = vmatprep.subr.bf16.mxu1 %v804_v2  ;;  %595 = vperm.xlu0 %769, %v590_v27  }
  0x1d   : > { %740 = vmatmul.mubr.msk.bf16.vlgmr.msra.gmra.mxu0 %vm372_vm0, %v783_v12 }
  0x1f   : > { %548 = vmatpush1.bf16.msra.mxu1 %v788_v14 }
  0x20   : > { %549 = vmatprep.subr.bf16.mxu1 %v804_v2  ;;  %615 = vperm.xlu0 %769, %v610_v28  }
  0x23   : > { %550 = vmatpush1.bf16.msra.mxu1 %v789_v15 }
  0x24   : > { %551 = vmatprep.subr.bf16.mxu1 %v804_v2 }
  0x27   : > { %552 = vmatpush1.bf16.msra.mxu1 %v790_v16 }
  0x28   : > { %553 = vmatprep.subr.bf16.mxu1 %v804_v2 }
  0x2b   : > { %554 = vmatpush1.bf16.msra.mxu1 %v791_v17 }
  0x2c   : > { %563 = vmatprep.subr.bf16.mxu1 %v804_v2 }
  0x2f   : > { %564 = vmatpush2.bf16.msra.mxu1 %v792_v18 }
  0x30   : > { %565 = vmatprep.subr.bf16.mxu1 %v804_v2 }
  0x33   : > { %566 = vmatpush2.bf16.msra.mxu1 %v793_v19 }
  0x34   : > { %567 = vmatprep.subr.bf16.mxu1 %v804_v2 }
  0x37   : > { %568 = vmatpush2.bf16.msra.mxu1 %v794_v20 }
  0x38   : > { %569 = vmatprep.subr.bf16.mxu1 %v804_v2 }
  0x3b   : > { %570 = vmatpush2.bf16.msra.mxu1 %v795_v21 }
  0x86   : > { %v605_v57 = vpop.permute.xlu1 %604 }
  0x93   : > { %v593_v55 = vpop.permute.xlu0 %592 }
  0x94   : > { %vm597_vm9 = vcmp.eq.s32.totalorder %v593_v55, 1  ;;  %v613_v5 = vpop.permute.xlu1 %612 }
  0x95   : > { %vm617_vm13 = vcmp.eq.s32.totalorder %v613_v5, 1 }
  0x97   : > { %v596_v62 = vpop.permute.xlu0 %595 }
  0x98   : > { %vm598_vm11 = vcmp.eq.s32.totalorder %v596_v62, 1 }
  0x9b   : > { %v616_v6 = vpop.permute.xlu0 %615 }
  0x9c   : > { %vm618_vm14 = vcmp.eq.s32.totalorder %v616_v6, 1 }
  0xdd   : > { %v410_v36 = vpop.f32.mrf.mxu0 }
  0xde   : > { %v411_v39 = vadd.f32 %v410_v36, %v320_v35 }
  0xdf   : > { %v412_v37 = vpop.f32.mrf.mxu0 }
  0xe0   : > { %v413_v38 = vadd.f32 %v412_v37, %v324_v34  ;;  %v423_v46 = vmul.f32 0.01, %v411_v39  ;;  %vm419_vm7 = vcmp.gt.f32.partialorder %v411_v39, 0.0 }
  0xe1   : > { %v414_v40 = vpop.f32.mrf.mxu0 }
  0xe2   : > { %v415_v41 = vadd.f32 %v414_v40, %v320_v35  ;;  %v424_v43 = vmul.f32 0.01, %v413_v38  ;;  %vm420_vm6 = vcmp.gt.f32.partialorder %v413_v38, 0.0  ;;  %v427_v52 = vsel %vm419_vm7, %v411_v39, %v423_v46 }
  0xe3   : > { %v416_v42 = vpop.f32.mrf.mxu0 }
  0xe4   : > { %vm421_vm5 = vcmp.gt.f32.partialorder %v415_v41, 0.0  ;;  %v425_v44 = vmul.f32 0.01, %v415_v41  ;;  %v417_v45 = vadd.f32 %v416_v42, %v324_v34  ;;  %v428_v49 = vsel %vm420_vm6, %v413_v38, %v424_v43 }
  0xe6   : > { %v426_v47 = vmul.f32 0.01, %v417_v45  ;;  %vm422_vm8 = vcmp.gt.f32.partialorder %v417_v45, 0.0  ;;  %v429_v48 = vsel %vm421_vm5, %v415_v41, %v425_v44 }
  0xe7   : > { %v431_v53 = vpack.c.bf16 %v429_v48, %v427_v52 }
  0xe8   : > { %v430_v50 = vsel %vm422_vm8, %v417_v45, %v426_v47 }
  0xe9   : > { %v432_v51 = vpack.c.bf16 %v430_v50, %v428_v49 }
  0xeb   : > { %754 = vmatprep.mubr.msk.bf16.mxu1 %vm372_vm0, %v432_v51 }
  0xec   : > { %572 = vmatmul.mubr.bf16.vlgmr.msra.gmra.mxu1 %v431_v53 }
 0x1ac   : > { %v573_v56 = vpop.f32.mrf.mxu1 }
 0x1ad   : > { %v574_v58 = vadd.f32 %v741_v54, %v573_v56 }
 0x1ae   : > { %v575_v59 = vpop.f32.mrf.mxu1 }
 0x1af   : > { %v607_v60 = vsel %vm597_vm9, %v574_v58, %v605_v57 }
 0x1b0   : > { %v576_v61 = vpop.f32.mrf.mxu1  ;;  %621 = vrot.lane.b32.xlu1 %v607_v60, %s806_s17 }
 0x1b1   : > { %v577_v63 = vadd.f32 %v741_v54, %v576_v61 }
 0x1b2   : > { %v578_v1 = vpop.f32.mrf.mxu1 }
 0x1b3   : > { %v608_v3 = vsel %vm598_vm11, %v577_v63, %v605_v57 }
 0x1b4   : > { %623 = vrot.lane.b32.xlu0 %v608_v3, %s806_s17  ;;  %632 = vperm.xlu1 %770, %v629_v0  }
 0x1b8   : > { %635 = vperm.xlu0 %769, %v630_v4  }
 0x222   : > { %v622_v7 = vpop.permute.xlu1 %621 }
 0x223   : > { %v627_v8 = vsel %vm617_vm13, %v574_v58, %v622_v7 }
 0x224   : > { %641 = vrot.lane.b32.xlu1 %v627_v8, %s806_s17 }
 0x226   : > { %v624_v9 = vpop.permute.xlu0 %623 }
 0x227   : > { %v628_v10 = vsel %vm618_vm14, %v577_v63, %v624_v9 }
 0x228   : > { %643 = vrot.lane.b32.xlu0 %v628_v10, %s806_s17 }
 0x22f   : > { %v633_v11 = vpop.permute.xlu1 %632 }
 0x230   : > { %vm637_vm0 = vcmp.eq.s32.totalorder %v633_v11, 1 }
 0x233   : > { %v636_v2 = vpop.permute.xlu0 %635 }
 0x234   : > { %vm638_vm1 = vcmp.eq.s32.totalorder %v636_v2, 1 }
 0x296   : > { %v642_v12 = vpop.permute.xlu1 %641 }
 0x297   : > { %v647_v13 = vsel %vm637_vm0, %v574_v58, %v642_v12 }
 0x298   : > { %650 = vst.msk [vmem:[%s302_s20] sm:$0xff] %vm649_vm15, %v647_v13 }
 0x29a   : > { %v644_v14 = vpop.permute.xlu0 %643 }
 0x29b   : > { %v648_v15 = vsel %vm638_vm1, %v577_v63, %v644_v14 }
 0x29c   : > { %651 = vst.msk [vmem:[%s302_s20 + $0x8] sm:$0xff] %vm649_vm15, %v648_v15 }
 0x29d PF: > { %s17_s24 = sadd.s32 1, %s802_s24  }
 0x29e   : > { %p14_p4 = scmp.ge.s32.totalorder %s17_s24, 4  }
 0x2a0   :  { %16 = sbr.rel (!%p14_p4) target bundleno = 1 (0x1), region = 81 }

</bundles_post_ra>
